<compile_context>
chip_gen: v7x
topology: tpu7x:2x2x1
jax: 0.10.0
libtpu: 0.0.40
codegen_flags: <defaults>
</compile_context>

<pallas_src>
import jax
import jax.numpy as jnp
from jax.experimental import pallas as pl
from jax.experimental.pallas import tpu as pltpu


def _asp_kernel(x_ref, u_ref, c_ref, mean_ref, var_ref):
    """Per-grid-step (one batch row):
       x_ref:    (1, T, D) f32 VMEM   one input sequence
       u_ref:    (1, 1, D) f32 VMEM   folded projection  u = W^T @ v
       c_ref:    (1,)      f32 SMEM   folded bias        c = b . v
       mean_ref: (1, 1, D) f32 VMEM
       var_ref:  (1, 1, D) f32 VMEM
    """
    x = x_ref[...]                                   # (1, T, D)
    T = x.shape[1]

    # ---- attention scores: tanh((x @ W^T + b) @ v) == tanh(x . u + c) ----
    s = jnp.tanh(jnp.sum(x * u_ref[...], axis=-1, keepdims=True) + c_ref[0])   # (1, T, 1)

    # ---- softmax over T (dim=1), numerically stable; T stays on sublanes ----
    m = jnp.max(s, axis=1, keepdims=True)            # (1, 1, 1)
    e = jnp.exp(s - m)                               # (1, T, 1)
    w = e / jnp.sum(e, axis=1, keepdims=True)        # (1, T, 1)

    # ---- fused weighted first / second moments (single pass over wx) ----
    wx = x * w                                       # (1, T, D)
    mean = jnp.sum(wx, axis=1, keepdims=True) * (1.0 / T)        # torch.mean over dim=1
    var = jnp.sum(x * wx, axis=1, keepdims=True) - mean * mean   # torch.sum over dim=1 - mean^2

    mean_ref[...] = mean
    var_ref[...] = var


def fold_attention_params(lin_w, lin_b, v):
    """Done ONCE at parameter-init time (not per call).
       (x @ W^T + b) @ v  ==  x @ (W^T @ v) + (b . v)."""
    u = (lin_w.T @ v).astype(jnp.float32).reshape(1, 1, -1)     # (1, 1, D)
    c = jnp.dot(lin_b, v).astype(jnp.float32).reshape(1)        # (1,)
    return u, c


def attentive_statistics_pooling(x, u, c):
    """x: (B, T, D) f32; u: (1, 1, D) f32; c: (1,) f32.
       Returns (mean, variance), each (B, D) f32."""
    B, T, D = x.shape
    mean3, var3 = pl.pallas_call(
        _asp_kernel,
        grid=(B,),
        in_specs=[
            pl.BlockSpec((1, T, D), lambda b: (b, 0, 0)),                  # x row
            pl.BlockSpec((1, 1, D), lambda b: (0, 0, 0)),                  # u (shared)
            pl.BlockSpec(memory_space=pltpu.MemorySpace.SMEM),             # c scalar
        ],
        out_specs=(
            pl.BlockSpec((1, 1, D), lambda b: (b, 0, 0)),
            pl.BlockSpec((1, 1, D), lambda b: (b, 0, 0)),
        ),
        out_shape=(jax.ShapeDtypeStruct((B, 1, D), jnp.float32),
                   jax.ShapeDtypeStruct((B, 1, D), jnp.float32)),
        compiler_params=pltpu.CompilerParams(
            dimension_semantics=("parallel",)),
    )(x.astype(jnp.float32), u, c)
    # Contiguous, metadata-only squeeze back to (B, D).
    return mean3.reshape(B, D), var3.reshape(B, D)


def _reference(x, lin_w, lin_b, v):
    """Pure-JAX reference mirroring the PyTorch forward op-for-op (unfolded)."""
    lin_out = x @ lin_w.T + lin_b                                # (B, T, E)
    scores = jnp.tanh(jnp.einsum('bte,e->bt', lin_out, v))       # bmm(v).squeeze()
    w = jax.nn.softmax(scores, axis=1)                           # softmax over dim=1
    el = x * w[:, :, None]
    mean = jnp.mean(el, axis=1)
    var = jnp.sum(x * el, axis=1) - mean * mean
    return mean, var


if __name__ == "__main__":
    key = jax.random.PRNGKey(0)
    k_x, k_w, k_b, k_v = jax.random.split(key, 4)

    B, T, D, E = 2, 8, 32, 16   # batch, seq, input_dim, embed_dim

    x = jax.random.normal(k_x, (B, T, D), dtype=jnp.float32)

    # Deterministic parameter init mirroring the module's __init__ scales:
    #   Linear(input_dim, embed_dim) weight/bias, v ~ randn(embed_dim)
    bnd = 1.0 / (D ** 0.5)
    lin_w = jax.random.normal(k_w, (E, D), dtype=jnp.float32) * bnd
    lin_b = jax.random.uniform(k_b, (E,), dtype=jnp.float32, minval=-bnd, maxval=bnd)
    v = jax.random.normal(k_v, (E,), dtype=jnp.float32)

    # Hoisted once at init (no per-call weight transforms).
    u, c = fold_attention_params(lin_w, lin_b, v)

    mean, var = attentive_statistics_pooling(x, u, c)
    mean, var = jax.block_until_ready((mean, var))

    mean_ref, var_ref = _reference(x, lin_w, lin_b, v)
    assert mean.shape == (B, D) and var.shape == (B, D), (mean.shape, var.shape)
    assert jnp.allclose(mean, mean_ref, atol=1e-4, rtol=1e-4), \
        float(jnp.max(jnp.abs(mean - mean_ref)))
    assert jnp.allclose(var, var_ref, atol=1e-4, rtol=1e-4), \
        float(jnp.max(jnp.abs(var - var_ref)))

    print("KERNEL_OK")
</pallas_src>

<mosaic_0001>
module attributes {stable_mosaic.version = 11 : i64} {
  func.func @_asp_kernel(%arg0: i32, %arg1: memref<1x8x32xf32, #tpu.memory_space<vmem>>, %arg2: memref<1x1x32xf32, #tpu.memory_space<vmem>>, %arg3: memref<1xf32, #tpu.memory_space<smem>>, %arg4: memref<1x1x32xf32, #tpu.memory_space<vmem>>, %arg5: memref<1x1x32xf32, #tpu.memory_space<vmem>>) attributes {dimension_semantics = [#tpu.dimension_semantics<parallel>], iteration_bounds = array<i64: 2>, scalar_prefetch = 0 : i64, scratch_operands = 0 : i64, tpu.core_type = #tpu.core_type<tc>, window_params = [{transform_indices = @transform_0, window_bounds = array<i64: 1, 8, 32>}, {pipeline_mode = #tpu.pipeline_mode<synchronous>, transform_indices = @transform_1, window_bounds = array<i64: 1, 1, 32>}, {transform_indices = @transform_2, window_bounds = array<i64: 1>}, {transform_indices = @transform_3, window_bounds = array<i64: 1, 1, 32>}, {transform_indices = @transform_4, window_bounds = array<i64: 1, 1, 32>}]} {
    %c0 = arith.constant 0 : index
    %c0_0 = arith.constant 0 : index
    %c0_1 = arith.constant 0 : index
    %0 = vector.load %arg1[%c0, %c0_0, %c0_1] : memref<1x8x32xf32, #tpu.memory_space<vmem>>, vector<1x8x32xf32>
    %c0_2 = arith.constant 0 : index
    %c0_3 = arith.constant 0 : index
    %c0_4 = arith.constant 0 : index
    %1 = vector.load %arg2[%c0_2, %c0_3, %c0_4] : memref<1x1x32xf32, #tpu.memory_space<vmem>>, vector<1x1x32xf32>
    %2 = vector.broadcast %1 : vector<1x1x32xf32> to vector<1x8x32xf32>
    %3 = arith.mulf %0, %2 : vector<1x8x32xf32>
    %cst = arith.constant dense<0.000000e+00> : vector<1x8xf32>
    %4 = vector.multi_reduction <add>, %3, %cst [2] : vector<1x8x32xf32> to vector<1x8xf32>
    %5 = vector.shape_cast %4 : vector<1x8xf32> to vector<1x8x1xf32>
    %c0_5 = arith.constant 0 : index
    %6 = memref.load %arg3[%c0_5] : memref<1xf32, #tpu.memory_space<smem>>
    %7 = vector.broadcast %6 : f32 to vector<1x8x1xf32>
    %8 = arith.addf %5, %7 : vector<1x8x1xf32>
    %9 = math.tanh %8 : vector<1x8x1xf32>
    %cst_6 = arith.constant dense<0xFF800000> : vector<1x1xf32>
    %10 = vector.multi_reduction <maximumf>, %9, %cst_6 [1] : vector<1x8x1xf32> to vector<1x1xf32>
    %11 = vector.shape_cast %10 : vector<1x1xf32> to vector<1x1x1xf32>
    %12 = vector.broadcast %11 : vector<1x1x1xf32> to vector<1x8x1xf32>
    %13 = arith.subf %9, %12 : vector<1x8x1xf32>
    %14 = math.exp %13 : vector<1x8x1xf32>
    %cst_7 = arith.constant dense<0.000000e+00> : vector<1x1xf32>
    %15 = vector.multi_reduction <add>, %14, %cst_7 [1] : vector<1x8x1xf32> to vector<1x1xf32>
    %16 = vector.shape_cast %15 : vector<1x1xf32> to vector<1x1x1xf32>
    %17 = vector.broadcast %16 : vector<1x1x1xf32> to vector<1x8x1xf32>
    %18 = arith.divf %14, %17 : vector<1x8x1xf32>
    %19 = vector.broadcast %18 : vector<1x8x1xf32> to vector<1x8x32xf32>
    %20 = arith.mulf %0, %19 : vector<1x8x32xf32>
    %cst_8 = arith.constant dense<0.000000e+00> : vector<1x32xf32>
    %21 = vector.multi_reduction <add>, %20, %cst_8 [1] : vector<1x8x32xf32> to vector<1x32xf32>
    %22 = vector.shape_cast %21 : vector<1x32xf32> to vector<1x1x32xf32>
    %cst_9 = arith.constant 1.250000e-01 : f32
    %23 = vector.broadcast %cst_9 : f32 to vector<1x1x32xf32>
    %24 = arith.mulf %22, %23 : vector<1x1x32xf32>
    %25 = arith.mulf %0, %20 : vector<1x8x32xf32>
    %cst_10 = arith.constant dense<0.000000e+00> : vector<1x32xf32>
    %26 = vector.multi_reduction <add>, %25, %cst_10 [1] : vector<1x8x32xf32> to vector<1x32xf32>
    %27 = vector.shape_cast %26 : vector<1x32xf32> to vector<1x1x32xf32>
    %28 = arith.mulf %24, %24 : vector<1x1x32xf32>
    %29 = arith.subf %27, %28 : vector<1x1x32xf32>
    %c0_11 = arith.constant 0 : index
    %c0_12 = arith.constant 0 : index
    %c0_13 = arith.constant 0 : index
    %30 = vector.load %arg4[%c0_11, %c0_12, %c0_13] : memref<1x1x32xf32, #tpu.memory_space<vmem>>, vector<1x1x32xf32>
    tpu.vector_store %arg4[%c0_11, %c0_12, %c0_13], %24 {strides = array<i32>} : memref<1x1x32xf32, #tpu.memory_space<vmem>>, vector<1x1x32xf32>,
    %c0_14 = arith.constant 0 : index
    %c0_15 = arith.constant 0 : index
    %c0_16 = arith.constant 0 : index
    %31 = vector.load %arg5[%c0_14, %c0_15, %c0_16] : memref<1x1x32xf32, #tpu.memory_space<vmem>>, vector<1x1x32xf32>
    tpu.vector_store %arg5[%c0_14, %c0_15, %c0_16], %29 {strides = array<i32>} : memref<1x1x32xf32, #tpu.memory_space<vmem>>, vector<1x1x32xf32>,
    return
  }
  func.func @transform_0(%arg0: i32) -> (i32, i32, i32) {
    %c0_i32 = arith.constant 0 : i32
    %c0_i32_0 = arith.constant 0 : i32
    %c0_i32_1 = arith.constant 0 : i32
    return %arg0, %c0_i32, %c0_i32_0 : i32, i32, i32
  }
  func.func @transform_1(%arg0: i32) -> (i32, i32, i32) {
    %c0_i32 = arith.constant 0 : i32
    %c0_i32_0 = arith.constant 0 : i32
    %c0_i32_1 = arith.constant 0 : i32
    %c0_i32_2 = arith.constant 0 : i32
    return %c0_i32, %c0_i32_0, %c0_i32_1 : i32, i32, i32
  }
  func.func @transform_2(%arg0: i32) -> i32 {
    %c0_i32 = arith.constant 0 : i32
    %c0_i32_0 = arith.constant 0 : i32
    return %c0_i32 : i32
  }
  func.func @transform_3(%arg0: i32) -> (i32, i32, i32) {
    %c0_i32 = arith.constant 0 : i32
    %c0_i32_0 = arith.constant 0 : i32
    %c0_i32_1 = arith.constant 0 : i32
    return %arg0, %c0_i32, %c0_i32_0 : i32, i32, i32
  }
  func.func @transform_4(%arg0: i32) -> (i32, i32, i32) {
    %c0_i32 = arith.constant 0 : i32
    %c0_i32_0 = arith.constant 0 : i32
    %c0_i32_1 = arith.constant 0 : i32
    return %arg0, %c0_i32, %c0_i32_0 : i32, i32, i32
  }
}

</mosaic_0001>

<bundles_post_ra>
// kernel: tpu_custom_call.1
= control target key start
LH: loop header
LB: loop body
LE: loop exit
PB: predicated region body
PF: predicated region fallthrough
CT: control target
= control target key end

     0   :  { %s844_s0 = inlined_call_operand.hbm [shape: f32[2,8,32], index: 0, kind: input, shape index: {}]   ;;  %s845_s1 = inlined_call_operand.vmem [shape: f32[1,1,32], index: 1, kind: input, shape index: {}]   ;;  %s846_s2 = inlined_call_operand.<no memory space> [shape: f32[1], index: 2, kind: input, shape index: {}]   ;;  %s847_s3 = inlined_call_operand.hbm [shape: f32[2,1,32], index: 3, kind: output, shape index: {0}]   ;;  %s848_s4 = inlined_call_operand.hbm [shape: f32[2,1,32], index: 4, kind: output, shape index: {1}]  }
   0x1   :  { %10 = sst [smem:[#allocation2]] %s846_s2 }
   0x2   :  { %11 = vsyncpa [#allocation4], 0 }
   0x3   :  { %13 = vsyncpa [#allocation4 + $0x1], 0 }
   0x4   :  { %14 = vsyncpa [#allocation5], 0 }
   0x5   :  { %16 = vsyncpa [#allocation5 + $0x1], 0 }
   0x6   :  { %17 = vsyncpa [#allocation8], 0 }
   0x7   :  { %19 = vsyncpa [#allocation8 + $0x1], 0  ;;  %s633_s17 = smov 0   ;;  %s635_s18 = smov 0  }
   0x8   :  { %s637_s19 = smov 0   ;;  %s639_s20 = smov 0  }
   0x9 LB: > { %s654_s2 = sadd.s32 4294967295, %s600_s20   ;;  %s403_s21 = sadd.s32 4294967294, %s600_s20   ;;  %s600_s20 = sphi %s639_s20, %s863_s20   ;;  %s596_s19 = sphi %s637_s19, %s862_s19   ;;  %s592_s18 = sphi %s635_s18, %s861_s18   ;;  %s588_s17 = sphi %s633_s17, %s860_s17  }
   0xa   : > { %s658_s22 = sadd.s32 1, %s600_s20   ;;  %s32_s23 = sadd.s32 1, %s596_s19 }
   0xb   : > { %s29_s24 = ssub.s32 %s600_s20, %s658_s22  ;;  %p39_p0 = scmp.ne.s32.totalorder %s596_s19, %s592_s18 }
   0xc   : > { %p30_p1 = scmp.eq.s32.totalorder %s29_s24, 0  ;;  %p40_p2 = scmp.eq.s32.totalorder %s600_s20, 0 }
   0xd   : > { %p45_p3 = scmp.ne.s32.totalorder %s592_s18, %s588_s17  ;;  %p46_p4 = scmp.eq.s32.totalorder %s654_s2, 0 }
   0xe   : > { %s670_s25 = scalar_select %p30_p1, %s596_s19, %s32_s23  }
   0xf   : > { %p672_p5 = por %p40_p2, %p39_p0  ;;  %p676_p6 = por %p46_p4, %p45_p3 }
  0x10   : > { %p111_p7 = scmp.eq.s32.totalorder %s654_s2, 1  ;;  %p117_p8 = scmp.eq.s32.totalorder %s403_s21, 1 }
  0x11   : > { %p432_p10 = scmp.lt.s32.totalorder %s600_s20, 2  ;;  %s169_s30 = sand.u32 1, %s596_s19  }
  0x12   : > { %p683_p11 = por %p111_p7, %p39_p0  ;;  %p687_p12 = por %p117_p8, %p45_p3 }
  0x13   : > { %s407_s5 = sshll.u32 %s600_s20, 7  ;;  %s406_s6 = sshll.u32 %s169_s30, 3 }
  0x14   : > { %s852_s28 = scalar_select %p683_p11, 1, 0 }
  0x15   : > { %s853_s29 = scalar_select %p687_p12, 1, 0 }
  0x16   : > { %s696_s9 = scalar_lea.hbm %s844_s0, %s407_s5  ;;  %s173_s10 = scalar_lea.vmem [#allocation3], %s406_s6 }
  0x17   : > { %s180_s11 = sshll.u32 %s173_s10, 4  ;;  %p700_p13 = pnand %p432_p10, %p672_p5  ;;  %s704_s11 = int_to_ptr.vmem [resolvable:$true] %s180_s11 }
  0x18   : > { %s170_s13 = scalar_lea.sflag [#allocation4], %s169_s30  ;;  %s472_s14 = scalar_lea.hbm %s696_s9, 128 }
  0x19   : > { %p473_p2 = scmp.ne.s32.totalorder %s696_s9, %s472_s14  ;;  %p474_p3 = pneg %p700_p13 }
  0x1a   : > { %s477_s21 = scalar_lea.hbm %s844_s0, 256  ;;  %p478_p5 = scmp.lt.u32.totalorder %s696_s9, %s844_s0 }
  0x1b   : > { %p475_p4 = pnand %p474_p3, %p473_p2  ;;  %p479_p8 = scmp.lt.u32.totalorder %s477_s21, %s472_s14 }
  0x1c   : > { %p481_p9 = scmp.lt.u32.totalorder %s472_s14, %s696_s9 }
  0x1d   : > { %p476_p7 = pneg %p475_p4  ;;  %p480_p10 = por %p479_p8, %p478_p5 }
  0x1f   : > { %p482_p0 = por %p481_p9, %p480_p10 }
  0x21   : > { %p483_p1 = pnand %p482_p0, %p476_p7 }
  0x23   : > { %486 = shalt.err (!%p483_p1)
}
  0x24   : > { %s487_s26 = scalar_lea.vmem %s704_s11, 128  ;;  %s602_s30 = smov [#allocation3]  }
  0x25   : > { %p488_p2 = scmp.ne.s32.totalorder %s704_s11, %s487_s26  ;;  %s492_s5 = sshll.u32 %s602_s30, 4  ;;  %s493_s5 = int_to_ptr.vmem [resolvable:$false] %s492_s5 }
  0x26   : > { %s494_s6 = scalar_lea.vmem %s493_s5, 256  ;;  %p495_p11 = scmp.lt.s32.totalorder %s704_s11, %s493_s5 }
  0x27   : > { %p490_p4 = pnand %p488_p2, %p474_p3  ;;  %p496_p5 = scmp.lt.s32.totalorder %s494_s6, %s487_s26 }
  0x29   : > { %p491_p12 = pneg %p490_p4  ;;  %p497_p8 = por %p496_p5, %p495_p11 }
  0x2b   : > { %p498_p9 = pnand %p497_p8, %p491_p12 }
  0x2d   : > { %501 = shalt.err (!%p498_p9)
}
  0x2e   : > { %424 = dma.hbm_to_vmem [thread:$0]  (!%p700_p13), %s696_s9, 128, %s704_s11, %s170_s13  }
  0x2f   : > { %p855_p0 = scmp.lt.s32.totalorder %s600_s20, 3  ;;  %p856_p1 = scmp.ge.s32.totalorder %s600_s20, 1 }
  0x31   : > { %p186_p3 = pnand %p856_p1, %p855_p0 }
  0x32   : > { %s738_s7 = sand.u32 (!%p186_p3), 1, %s592_s18  }
  0x33   : > { %189 = sbr.rel (%p186_p3) target bundleno = 325 (0x145), region = 32  ;;  %s409_s8 = sshll.u32 (!%p186_p3), %s738_s7, 3 }
  0x34   : > { %s192_s10 = scalar_lea.sflag (!%p186_p3), [#allocation4], %s738_s7  ;;  %s195_s14 = scalar_lea.vmem (!%p186_p3), [#allocation3], %s409_s8 }
  0x3a   : > { %575 = dma.done.wait (%p676_p6), %s192_s10, 128  }
  0x3b   : > { %577 = vsyncadd (%p676_p6), %s192_s10, 4294967168  ;;  %v223_v0 = vld [vmem:[%s195_s14] sm:$0xff]  ;;  %vm232_vm0 = vcmask 261120   ;;  %s236_s12 = sld [smem:[#allocation2]]  ;;  %s411_s27 = sshll.u32 %s654_s2, 4  ;;  %vm276_vm1 = vcmask 253952  }
  0x3c   : > { %v410_v1 = vld [vmem:[%s845_s1] ss:$0 sm:$0xff]  ;;  %s216_s13 = scalar_lea.vmem [#allocation6], %s738_s7  ;;  %s759_s23 = scalar_lea.hbm %s847_s3, %s411_s27 }
  0x3d   : > { %v231_v2 = vmul.f32 %v410_v1, %v223_v0  ;;  %s296_s15 = sshll.u32 %s216_s13, 4  ;;  %s222_s24 = scalar_lea.vmem [#allocation7], %s738_s7  ;;  %s761_s15 = int_to_ptr.vmem [resolvable:$true] %s296_s15 }
  0x3e   : > { %s766_s26 = sshll.u32 %s222_s24, 4  ;;  %s280_s30 = scalar_lea.sflag [#allocation5], %s738_s7  ;;  %s799_s26 = int_to_ptr.vmem [resolvable:$true] %s766_s26 }
  0x3f   : > { %v233_v3 = vsel %vm232_vm0, %v231_v2, 0.0  ;;  %s502_s5 = scalar_lea.vmem %s761_s15, 16  ;;  %p857_p11 = scmp.ne.s32.totalorder %s852_s28, 0 }
  0x40   : > { %234 = vadd.xlane.f32.xlu0 %v233_v3  ;;  %p503_p6 = scmp.ne.s32.totalorder %s761_s15, %s502_s5  ;;  %s603_s6 = smov [#allocation6]  }
  0x41   : > { %v237_v4 = vstv %s236_s12  ;;  %s506_s8 = sshll.u32 %s603_s6, 4  ;;  %s507_s8 = int_to_ptr.vmem [resolvable:$false] %s506_s8 }
  0x42   : > { %p504_p12 = pnand %p503_p6, %p857_p11  ;;  %s508_s10 = scalar_lea.vmem %s507_s8, 32 }
  0x43   : > { %p509_p7 = scmp.lt.s32.totalorder %s761_s15, %s507_s8  ;;  %p510_p10 = scmp.lt.s32.totalorder %s508_s10, %s502_s5 }
  0x44   : > { %p505_p13 = pneg %p504_p12 }
  0x45   : > { %p511_p2 = por %p510_p10, %p509_p7 }
  0x47   : > { %p512_p4 = pnand %p511_p2, %p505_p13 }
  0xcd   : > { %v235_v5 = vpop.xlane.xlu0 %234 }
  0xce   : > { %v238_v6 = vadd.f32 %v237_v4, %v235_v5 }
  0xd0   : > { %466 = vtanh.f32 %v238_v6 }
  0xda   : > { %v467_v7 = vpop.eup %466 }
  0xdb   : > { %v240_v8 = vrot.slane %v467_v7, 4 }
  0xdd   : > { %v241_v9 = vmax.f32 %v467_v7, %v240_v8 }
  0xdf   : > { %v242_v10 = vrot.slane %v241_v9, 2 }
  0xe1   : > { %v243_v11 = vmax.f32 %v241_v9, %v242_v10 }
  0xe3   : > { %v244_v12 = vrot.slane %v243_v11, 1 }
  0xe5   : > { %v245_v13 = vmax.f32 %v243_v11, %v244_v12 }
  0xe7   : > { %v246_v14 = vsub.f32 %v467_v7, %v245_v13 }
  0xe9   : > { %v247_v15 = vmul.f32 1.442695, %v246_v14 }
  0xeb   : > { %468 = vpow2.f32 %v247_v15 }
  0xf5   : > { %v469_v16 = vpop.eup %468 }
  0xf6   : > { %v249_v17 = vrot.slane %v469_v16, 4 }
  0xf8   : > { %v250_v18 = vadd.f32 %v469_v16, %v249_v17 }
  0xfa   : > { %v251_v19 = vrot.slane %v250_v18, 2 }
  0xfc   : > { %v252_v20 = vadd.f32 %v251_v19, %v250_v18 }
  0xfe   : > { %v253_v21 = vrot.slane %v252_v20, 1 }
 0x100   : > { %v254_v22 = vadd.f32 %v253_v21, %v252_v20 }
 0x102   : > { %470 = vrcp.f32 %v254_v22 }
 0x10c   : > { %v471_v23 = vpop.eup %470 }
 0x10d   : > { %v256_v24 = vmul.f32 %v471_v23, %v469_v16 }
 0x10f   : > { %v257_v25 = vmul.f32 %v256_v24, %v223_v0 }
 0x111   : > { %v258_v26 = vsel %vm232_vm0, %v257_v25, 0.0  ;;  %v266_v27 = vmul.f32 %v257_v25, %v223_v0 }
 0x112   : > { %v259_v28 = vrot.slane %v258_v26, 4 }
 0x113   : > { %v267_v29 = vsel %vm232_vm0, %v266_v27, 0.0 }
 0x114   : > { %v260_v30 = vadd.f32 %v259_v28, %v258_v26  ;;  %v268_v31 = vrot.slane %v267_v29, 4 }
 0x116   : > { %v261_v32 = vrot.slane %v260_v30, 2  ;;  %v269_v33 = vadd.f32 %v268_v31, %v267_v29 }
 0x118   : > { %v262_v34 = vadd.f32 %v261_v32, %v260_v30  ;;  %v270_v35 = vrot.slane %v269_v33, 2 }
 0x11a   : > { %v263_v36 = vrot.slane %v262_v34, 1  ;;  %v271_v37 = vadd.f32 %v270_v35, %v269_v33 }
 0x11c   : > { %v264_v38 = vadd.f32 %v263_v36, %v262_v34  ;;  %v272_v39 = vrot.slane %v271_v37, 1 }
 0x11e   : > { %v265_v40 = vmul.f32 0.125, %v264_v38  ;;  %v273_v41 = vadd.f32 %v272_v39, %v271_v37 }
 0x120   : > { %277 = vst.msk [vmem:[%s216_s13] sm:$0x1] %vm276_vm1, %v265_v40  ;;  %v274_v42 = vmul.f32 %v265_v40, %v265_v40 }
 0x121   : > { %515 = shalt.err (!%p512_p4)
}
 0x122   : > { %s516_s14 = scalar_lea.hbm %s759_s23, 16  ;;  %s520_s12 = scalar_lea.hbm %s847_s3, 32 }
 0x123   : > { %p517_p5 = scmp.ne.s32.totalorder %s759_s23, %s516_s14  ;;  %p521_p0 = scmp.lt.u32.totalorder %s759_s23, %s847_s3 }
 0x124   : > { %p522_p1 = scmp.lt.u32.totalorder %s520_s12, %s516_s14  ;;  %p524_p6 = scmp.lt.u32.totalorder %s516_s14, %s759_s23 }
 0x125   : > { %p518_p8 = pnand %p517_p5, %p857_p11 }
 0x126   : > { %p523_p3 = por %p522_p1, %p521_p0 }
 0x127   : > { %p519_p9 = pneg %p518_p8 }
 0x128   : > { %p525_p12 = por %p524_p6, %p523_p3 }
 0x12a   : > { %p526_p13 = pnand %p525_p12, %p519_p9 }
 0x12c   : > { %529 = shalt.err (!%p526_p13)
}
 0x12d   : > { %417 = dma.vmem_to_hbm [thread:$0]  (%p857_p11), %s761_s15, 16, %s759_s23, %s280_s30   ;;  %v275_v43 = vsub.f32 %v273_v41, %v274_v42 }
 0x12e   : > { %s796_s6 = scalar_lea.hbm %s848_s4, %s411_s27  ;;  %s284_s8 = scalar_lea.sflag [#allocation8], %s738_s7 }
 0x12f   : > { %278 = vst.msk [vmem:[%s222_s24] sm:$0x1] %vm276_vm1, %v275_v43  ;;  %s530_s10 = scalar_lea.vmem %s799_s26, 16  ;;  %s604_s2 = smov [#allocation7]  }
 0x130   : > { %p531_p7 = scmp.ne.s32.totalorder %s799_s26, %s530_s10  ;;  %s534_s15 = sshll.u32 %s604_s2, 4  ;;  %s535_s15 = int_to_ptr.vmem [resolvable:$false] %s534_s15 }
 0x131   : > { %s536_s23 = scalar_lea.vmem %s535_s15, 32  ;;  %p537_p4 = scmp.lt.s32.totalorder %s799_s26, %s535_s15 }
 0x132   : > { %p532_p10 = pnand %p531_p7, %p857_p11  ;;  %p538_p5 = scmp.lt.s32.totalorder %s536_s23, %s530_s10 }
 0x134   : > { %p533_p2 = pneg %p532_p10  ;;  %p539_p8 = por %p538_p5, %p537_p4 }
 0x136   : > { %p540_p9 = pnand %p539_p8, %p533_p2 }
 0x138   : > { %543 = shalt.err (!%p540_p9)
}
 0x139   : > { %s544_s7 = scalar_lea.hbm %s796_s6, 16  ;;  %s548_s30 = scalar_lea.hbm %s848_s4, 32 }
 0x13a   : > { %p545_p0 = scmp.ne.s32.totalorder %s796_s6, %s544_s7  ;;  %p549_p6 = scmp.lt.u32.totalorder %s796_s6, %s848_s4 }
 0x13b   : > { %p550_p12 = scmp.lt.u32.totalorder %s548_s30, %s544_s7  ;;  %p552_p7 = scmp.lt.u32.totalorder %s544_s7, %s796_s6 }
 0x13c   : > { %p546_p1 = pnand %p545_p0, %p857_p11 }
 0x13d   : > { %p551_p13 = por %p550_p12, %p549_p6 }
 0x13e   : > { %p547_p3 = pneg %p546_p1 }
 0x13f   : > { %p553_p10 = por %p552_p7, %p551_p13 }
 0x141   : > { %p554_p2 = pnand %p553_p10, %p547_p3 }
 0x143   : > { %557 = shalt.err (!%p554_p2)
}
 0x144   : > { %418 = dma.vmem_to_hbm [thread:$0]  (%p857_p11), %s799_s26, 16, %s796_s6, %s284_s8  }
 0x145 PF: > { %s321_s11 = sand.u32 1, %s588_s17   ;;  %p858_p4 = scmp.ne.s32.totalorder %s853_s29, 0 }
 0x146   : > { %p859_p5 = scmp.ge.s32.totalorder %s600_s20, 2  ;;  %s322_s12 = scalar_lea.sflag [#allocation5], %s321_s11 }
 0x148   : > { %p426_p8 = pnand %p859_p5, %p858_p4 }
 0x14a   : > { %579 = dma.done.wait (!%p426_p8), %s322_s12, 16  }
 0x14b   : > { %581 = vsyncadd (!%p426_p8), %s322_s12, 4294967280  ;;  %s330_s13 = scalar_lea.sflag [#allocation8], %s321_s11 }
 0x14c   : > { %583 = dma.done.wait (!%p426_p8), %s330_s13, 16  }
 0x14d   : > { %585 = vsyncadd (!%p426_p8), %s330_s13, 4294967280  ;;  %p22_p11 = scmp.ge.s32.totalorder %s658_s22, 4   ;;  %s860_s17 = smov %s592_s18 }
 0x14e   : > { %s861_s18 = smov %s596_s19  ;;  %s862_s19 = smov %s670_s25 }
 0x14f   : > { %s863_s20 = smov %s658_s22  ;;  %24 = sbr.rel (!%p22_p11) target bundleno = 9 (0x9), region = 94 }
 0x156   :  { %334 = vsyncpa [#allocation4], 1 }
 0x157   :  { %336 = vsyncpa [#allocation4 + $0x1], 1 }
 0x158   :  { %337 = vsyncpa [#allocation5], 1 }
 0x159   :  { %339 = vsyncpa [#allocation5 + $0x1], 1 }
 0x15a   :  { %340 = vsyncpa [#allocation8], 1 }
 0x15b   :  { %342 = vsyncpa [#allocation8 + $0x1], 1 }

</bundles_post_ra>
